<compile_context>
chip_gen: v5e
topology: v5e:2x2
jax: 0.10.0
libtpu: 0.0.40
codegen_flags: <defaults>
</compile_context>

<pallas_src>
import jax
import jax.numpy as jnp
from jax.experimental import pallas as pl
from jax.experimental.pallas import tpu as pltpu


def _round_up(x, m):
    return ((x + m - 1) // m) * m


def _vmem_capacity_bytes():
    """Physical VMEM of the current TPU generation (conservative 64 MiB fallback)."""
    try:
        info = pltpu.get_tpu_info()
        for attr in ("vmem_capacity_bytes", "vmem_bytes", "vmem_size_bytes"):
            v = getattr(info, attr, None)
            if v:
                return int(v)
    except Exception:
        pass
    return 64 << 20


def _vmem_estimate(tile_m, tile_f, d_model_p, compute_bytes, out_bytes, use_scratch):
    est = (2 * tile_m * d_model_p * compute_bytes      # x tile (double-buffered)
           + 2 * tile_m * d_model_p * out_bytes        # out tile (double-buffered)
           + 2 * d_model_p * tile_f * compute_bytes    # W1^T chunk (double-buffered)
           + 2 * tile_f * d_model_p * compute_bytes    # W2^T chunk (double-buffered)
           + 4 * (tile_f + d_model_p) * 4)             # bias chunks (tiny)
    if use_scratch:
        est += tile_m * d_model_p * 4                  # f32 accumulator scratch
    return est


def _choose_tiles(d_model_p, compute_bytes, vmem_cap, tile_m=None, tile_f=None):
    """Pick (tile_m, tile_f): shrink tile_f first (floor 512), then tile_m, so
    VMEM is spent on tile_m (weight-stream arithmetic intensity ~ tile_m)."""
    budget = int(0.85 * vmem_cap)
    tm = 512 if tile_m is None else tile_m
    tf = 1024 if tile_f is None else tile_f
    if tile_f is None:
        while (_vmem_estimate(tm, tf, d_model_p, compute_bytes, 4, True) > budget
               and tf > 512):
            tf //= 2
    if tile_m is None:
        while (_vmem_estimate(tm, tf, d_model_p, compute_bytes, 4, True) > budget
               and tm > 128):
            tm //= 2
    return tm, tf


def _ffn_kernel_scratch(x_ref, w1t_ref, b1_ref, w2t_ref, b2_ref, o_ref, acc_ref):
    """Narrow output dtype: accumulate in an f32 scratch, cast on the last chunk."""
    f = pl.program_id(1)
    h = jnp.dot(x_ref[...], w1t_ref[...], preferred_element_type=jnp.float32)
    h = jnp.maximum(h + b1_ref[...], 0.0)                      # bias + ReLU in f32
    part = jnp.dot(h.astype(w2t_ref.dtype), w2t_ref[...],
                   preferred_element_type=jnp.float32)

    @pl.when(f == 0)
    def _first():
        acc_ref[...] = part + b2_ref[...]          # no zero-init + RMW on chunk 0

    @pl.when(f > 0)
    def _rest():
        acc_ref[...] += part

    @pl.when(f == pl.num_programs(1) - 1)
    def _finalize():
        o_ref[...] = acc_ref[...].astype(o_ref.dtype)


def _ffn_kernel_f32_out(x_ref, w1t_ref, b1_ref, w2t_ref, b2_ref, o_ref):
    """float32 output: accumulate directly into the resident output tile."""
    f = pl.program_id(1)
    h = jnp.dot(x_ref[...], w1t_ref[...], preferred_element_type=jnp.float32)
    h = jnp.maximum(h + b1_ref[...], 0.0)
    part = jnp.dot(h.astype(w2t_ref.dtype), w2t_ref[...],
                   preferred_element_type=jnp.float32)

    @pl.when(f == 0)
    def _first():
        o_ref[...] = part + b2_ref[...]

    @pl.when(f > 0)
    def _rest():
        o_ref[...] += part


class FeedForwardFullPallas:
    """Fused Linear->ReLU->Linear. Weight layout (pad + transpose + cast) is done
    once at construction; __call__ only pads/casts the activations and runs the
    Pallas kernel (tokens tiled on a 'parallel' axis, d_ff streamed/accumulated
    on an 'arbitrary' axis)."""

    def __init__(self, w1, b1, w2, b2, *, compute_dtype=jnp.bfloat16,
                 tile_m=None, tile_f=None):
        w1 = jnp.asarray(w1); b1 = jnp.asarray(b1)
        w2 = jnp.asarray(w2); b2 = jnp.asarray(b2)
        d_ff, d_model = w1.shape
        assert w2.shape == (d_model, d_ff)
        self.d_model = d_model
        self.d_ff = d_ff
        self.compute_dtype = jnp.dtype(compute_dtype)
        self.d_model_p = _round_up(d_model, 128)             # lane-dense output
        self.vmem_cap = _vmem_capacity_bytes()

        cbytes = self.compute_dtype.itemsize
        tm, tf = _choose_tiles(self.d_model_p, cbytes, self.vmem_cap, tile_m, tile_f)
        tf = max(128, _round_up(min(tf, d_ff), 128))
        self.tile_m = tm
        self.tile_f = tf
        self.d_ff_p = _round_up(d_ff, tf)

        # One-time weight prep. Zero padding is exact: ReLU(0)=0 and zero W2
        # rows contribute 0, so padding never perturbs the result.
        self.w1t = jnp.pad(w1.T, ((0, self.d_model_p - d_model),
                                  (0, self.d_ff_p - d_ff))).astype(compute_dtype)
        self.w2t = jnp.pad(w2.T, ((0, self.d_ff_p - d_ff),
                                  (0, self.d_model_p - d_model))).astype(compute_dtype)
        self.b1 = jnp.pad(b1.astype(jnp.float32),
                          (0, self.d_ff_p - d_ff)).reshape(1, self.d_ff_p)
        self.b2 = jnp.pad(b2.astype(jnp.float32),
                          (0, self.d_model_p - d_model)).reshape(1, self.d_model_p)

    def __call__(self, x):
        d_model, d_model_p = self.d_model, self.d_model_p
        assert x.shape[-1] == d_model
        lead_shape = x.shape[:-1]
        M = 1
        for s in lead_shape:
            M *= s
        out_dtype = x.dtype
        cdt = self.compute_dtype

        # Token-tile size: sublane multiple of the compute dtype (16 for bf16),
        # 128-aligned when M permits; keep >=2 token tiles when M is large so
        # the 'parallel' axis can split across cores.
        sub = max(8, 32 // cdt.itemsize)
        align = 128 if M >= 128 else sub
        tm = max(sub, _round_up(min(self.tile_m, M), align))
        if M >= 512 and _round_up(M, tm) // tm < 2:
            tm = max(256, _round_up((M + 1) // 2, align))
        M_p = _round_up(M, tm)

        tf = self.tile_f
        nf = self.d_ff_p // tf
        grid = (M_p // tm, nf)

        x2d = jnp.pad(x.reshape(M, d_model),
                      ((0, M_p - M), (0, d_model_p - d_model))).astype(cdt)

        use_scratch = out_dtype != jnp.float32
        kernel = _ffn_kernel_scratch if use_scratch else _ffn_kernel_f32_out
        scratch = [pltpu.VMEM((tm, d_model_p), jnp.float32)] if use_scratch else []

        # Serpentine d_ff traversal: reverse f on odd token tiles so the last
        # weight chunk stays resident across the i -> i+1 boundary.
        def _f_ser(i, f):
            return f + (i % 2) * (nf - 1 - 2 * f)

        vmem_est = _vmem_estimate(tm, tf, d_model_p, cdt.itemsize,
                                  jnp.dtype(out_dtype).itemsize, use_scratch)
        vmem_limit = int(min(self.vmem_cap,
                             max(int(vmem_est * 1.4) + (2 << 20), 32 << 20)))

        out2d = pl.pallas_call(
            kernel,
            out_shape=jax.ShapeDtypeStruct((M_p, d_model_p), out_dtype),
            grid_spec=pltpu.PrefetchScalarGridSpec(
                num_scalar_prefetch=0,
                grid=grid,
                in_specs=[
                    pl.BlockSpec((tm, d_model_p), lambda i, f: (i, 0)),            # x tile
                    pl.BlockSpec((d_model_p, tf), lambda i, f: (0, _f_ser(i, f))),  # W1^T chunk
                    pl.BlockSpec((1, tf),         lambda i, f: (0, _f_ser(i, f))),  # b1 chunk
                    pl.BlockSpec((tf, d_model_p), lambda i, f: (_f_ser(i, f), 0)),  # W2^T chunk
                    pl.BlockSpec((1, d_model_p),  lambda i, f: (0, 0)),             # b2
                ],
                out_specs=pl.BlockSpec((tm, d_model_p), lambda i, f: (i, 0)),
                scratch_shapes=scratch,
            ),
            compiler_params=pltpu.CompilerParams(
                dimension_semantics=("parallel", "arbitrary"),
                vmem_limit_bytes=vmem_limit,
            ),
        )(x2d, self.w1t, self.b1, self.w2t, self.b2)

        return out2d[:M, :d_model].reshape(*lead_shape, d_model)


def feed_forward_full(x, w1, b1, w2, b2, *, compute_dtype=jnp.bfloat16,
                      tile_m=None, tile_f=None):
    """One-shot convenience wrapper (weight prep happens per call). For repeated
    forwards, construct FeedForwardFullPallas once and reuse it."""
    ffn = FeedForwardFullPallas(w1, b1, w2, b2, compute_dtype=compute_dtype,
                                tile_m=tile_m, tile_f=tile_f)
    return ffn(x)


def init_params(key, d_model, d_ff, dtype=jnp.float32):
    # Deterministic init mimicking nn.Linear default (uniform +-1/sqrt(fan_in)).
    k1, k2, k3, k4 = jax.random.split(key, 4)
    lim1 = 1.0 / (d_model ** 0.5)
    lim2 = 1.0 / (d_ff ** 0.5)
    w1 = jax.random.uniform(k1, (d_ff, d_model), dtype, -lim1, lim1)
    b1 = jax.random.uniform(k2, (d_ff,), dtype, -lim1, lim1)
    w2 = jax.random.uniform(k3, (d_model, d_ff), dtype, -lim2, lim2)
    b2 = jax.random.uniform(k4, (d_model,), dtype, -lim2, lim2)
    return w1, b1, w2, b2


def _ref(x, w1, b1, w2, b2):
    h = jnp.maximum(x @ w1.T + b1, 0.0)
    return h @ w2.T + b2


if __name__ == "__main__":
    key = jax.random.PRNGKey(0)

    # Check 1: small shapes, f32 compute, exercises d_model/d_ff/M padding.
    batch, seq, d_model, d_ff = 2, 8, 32, 64
    kx, kp, key = jax.random.split(key, 3)
    x = jax.random.normal(kx, (batch, seq, d_model), jnp.float32)
    w1, b1, w2, b2 = init_params(kp, d_model, d_ff)
    out = jax.block_until_ready(
        feed_forward_full(x, w1, b1, w2, b2, compute_dtype=jnp.float32))
    y_ref = _ref(x, w1, b1, w2, b2)
    assert out.shape == y_ref.shape == (batch, seq, d_model)
    assert jnp.allclose(out, y_ref, atol=1e-4, rtol=1e-4)

    # Check 2: multi-step grid on both axes (token tiling + serpentine d_ff
    # accumulation directly into the resident f32 output tile), with the
    # weights prepared once (prepared-params path).
    batch2, seq2, d_model2, d_ff2 = 4, 8, 128, 256
    kx2, kp2, key = jax.random.split(key, 3)
    x2 = jax.random.normal(kx2, (batch2, seq2, d_model2), jnp.float32)
    p2 = init_params(kp2, d_model2, d_ff2)
    ffn2 = FeedForwardFullPallas(*p2, compute_dtype=jnp.float32,
                                 tile_m=16, tile_f=128)
    out2 = jax.block_until_ready(ffn2(x2))
    y2_ref = _ref(x2, *p2)
    assert out2.shape == y2_ref.shape == (batch2, seq2, d_model2)
    assert jnp.allclose(out2, y2_ref, atol=1e-4, rtol=1e-4)

    # Check 3: default bf16 compute with bf16 activations -> f32-scratch
    # accumulator path; looser tolerance vs the f32 reference (expected).
    x3 = x2.astype(jnp.bfloat16)
    ffn3 = FeedForwardFullPallas(*p2, tile_m=16, tile_f=128)  # bf16 by default
    out3 = jax.block_until_ready(ffn3(x3))
    assert out3.dtype == jnp.bfloat16 and out3.shape == y2_ref.shape
    assert jnp.allclose(out3.astype(jnp.float32), y2_ref, atol=5e-2, rtol=5e-2)

    print("KERNEL_OK")
</pallas_src>

<mosaic_0001>
module attributes {stable_mosaic.version = 11 : i64} {
  func.func @_ffn_kernel_f32_out(%arg0: i32, %arg1: i32, %arg2: memref<16x128xf32, #tpu.memory_space<vmem>>, %arg3: memref<128x128xf32, #tpu.memory_space<vmem>>, %arg4: memref<1x128xf32, #tpu.memory_space<vmem>>, %arg5: memref<128x128xf32, #tpu.memory_space<vmem>>, %arg6: memref<1x128xf32, #tpu.memory_space<vmem>>, %arg7: memref<16x128xf32, #tpu.memory_space<vmem>>) attributes {dimension_semantics = [#tpu.dimension_semantics<parallel>, #tpu.dimension_semantics<arbitrary>], iteration_bounds = array<i64: 1, 1>, scalar_prefetch = 0 : i64, scratch_operands = 0 : i64, tpu.core_type = #tpu.core_type<tc>, window_params = [{transform_indices = @transform_0, window_bounds = array<i64: 16, 128>}, {transform_indices = @transform_1, window_bounds = array<i64: 128, 128>}, {transform_indices = @transform_2, window_bounds = array<i64: 1, 128>}, {transform_indices = @transform_3, window_bounds = array<i64: 128, 128>}, {pipeline_mode = #tpu.pipeline_mode<synchronous>, transform_indices = @transform_4, window_bounds = array<i64: 1, 128>}, {transform_indices = @transform_5, window_bounds = array<i64: 16, 128>}]} {
    %c0 = arith.constant 0 : index
    %c0_0 = arith.constant 0 : index
    %0 = vector.load %arg2[%c0, %c0_0] : memref<16x128xf32, #tpu.memory_space<vmem>>, vector<16x128xf32>
    %c0_1 = arith.constant 0 : index
    %c0_2 = arith.constant 0 : index
    %1 = vector.load %arg3[%c0_1, %c0_2] : memref<128x128xf32, #tpu.memory_space<vmem>>, vector<128x128xf32>
    %cst = arith.constant dense<0.000000e+00> : vector<16x128xf32>
    %2 = tpu.matmul %0, %1, %cst {dimension_numbers = #tpu.dot_dimension_numbers<[1], [0], [0], [1], [0, 0, 1, 1], [], []>} : vector<16x128xf32>, vector<128x128xf32>, vector<16x128xf32> -> vector<16x128xf32>
    %c0_3 = arith.constant 0 : index
    %c0_4 = arith.constant 0 : index
    %3 = vector.load %arg4[%c0_3, %c0_4] : memref<1x128xf32, #tpu.memory_space<vmem>>, vector<1x128xf32>
    %4 = vector.broadcast %3 : vector<1x128xf32> to vector<16x128xf32>
    %5 = arith.addf %2, %4 : vector<16x128xf32>
    %cst_5 = arith.constant 0.000000e+00 : f32
    %6 = vector.broadcast %cst_5 : f32 to vector<16x128xf32>
    %7 = arith.maximumf %5, %6 : vector<16x128xf32>
    %c0_6 = arith.constant 0 : index
    %c0_7 = arith.constant 0 : index
    %8 = vector.load %arg5[%c0_6, %c0_7] : memref<128x128xf32, #tpu.memory_space<vmem>>, vector<128x128xf32>
    %cst_8 = arith.constant dense<0.000000e+00> : vector<16x128xf32>
    %9 = tpu.matmul %7, %8, %cst_8 {dimension_numbers = #tpu.dot_dimension_numbers<[1], [0], [0], [1], [0, 0, 1, 1], [], []>} : vector<16x128xf32>, vector<128x128xf32>, vector<16x128xf32> -> vector<16x128xf32>
    %c0_i32 = arith.constant 0 : i32
    %10 = arith.cmpi eq, %arg1, %c0_i32 : i32
    %11 = arith.extui %10 : i1 to i32
    %c0_i32_9 = arith.constant 0 : i32
    %12 = arith.cmpi ne, %11, %c0_i32_9 : i32
    scf.if %12 {
      %c0_12 = arith.constant 0 : index
      %c0_13 = arith.constant 0 : index
      %16 = vector.load %arg6[%c0_12, %c0_13] : memref<1x128xf32, #tpu.memory_space<vmem>>, vector<1x128xf32>
      %17 = vector.broadcast %16 : vector<1x128xf32> to vector<16x128xf32>
      %18 = arith.addf %9, %17 : vector<16x128xf32>
      %c0_14 = arith.constant 0 : index
      %c0_15 = arith.constant 0 : index
      %19 = vector.load %arg7[%c0_14, %c0_15] : memref<16x128xf32, #tpu.memory_space<vmem>>, vector<16x128xf32>
      tpu.vector_store %arg7[%c0_14, %c0_15], %18 {strides = array<i32>} : memref<16x128xf32, #tpu.memory_space<vmem>>, vector<16x128xf32>,
    } else {
    }
    %c0_i32_10 = arith.constant 0 : i32
    %13 = arith.cmpi sgt, %arg1, %c0_i32_10 : i32
    %14 = arith.extui %13 : i1 to i32
    %c0_i32_11 = arith.constant 0 : i32
    %15 = arith.cmpi ne, %14, %c0_i32_11 : i32
    scf.if %15 {
      %c0_12 = arith.constant 0 : index
      %c0_13 = arith.constant 0 : index
      %16 = vector.load %arg7[%c0_12, %c0_13] : memref<16x128xf32, #tpu.memory_space<vmem>>, vector<16x128xf32>
      %17 = arith.addf %16, %9 : vector<16x128xf32>
      %c0_14 = arith.constant 0 : index
      %c0_15 = arith.constant 0 : index
      %18 = vector.load %arg7[%c0_14, %c0_15] : memref<16x128xf32, #tpu.memory_space<vmem>>, vector<16x128xf32>
      tpu.vector_store %arg7[%c0_14, %c0_15], %17 {strides = array<i32>} : memref<16x128xf32, #tpu.memory_space<vmem>>, vector<16x128xf32>,
    } else {
    }
    return
  }
  func.func @transform_0(%arg0: i32, %arg1: i32) -> (i32, i32) {
    %c0_i32 = arith.constant 0 : i32
    %c0_i32_0 = arith.constant 0 : i32
    return %arg0, %c0_i32 : i32, i32
  }
  func.func @transform_1(%arg0: i32, %arg1: i32) -> (i32, i32) {
    %c2_i32 = arith.constant 2 : i32
    %c0_i32 = arith.constant 0 : i32
    %0 = arith.cmpi eq, %c2_i32, %c0_i32 : i32
    %c1_i32 = arith.constant 1 : i32
    %1 = arith.select %0, %c1_i32, %c2_i32 : i32
    %2 = arith.remsi %arg0, %1 : i32
    %c0_i32_0 = arith.constant 0 : i32
    %3 = arith.cmpi ne, %2, %c0_i32_0 : i32
    %c0_i32_1 = arith.constant 0 : i32
    %4 = arith.cmpi slt, %2, %c0_i32_1 : i32
    %c0_i32_2 = arith.constant 0 : i32
    %5 = arith.cmpi slt, %1, %c0_i32_2 : i32
    %6 = arith.xori %4, %5 : i1
    %7 = arith.andi %6, %3 : i1
    %8 = arith.addi %2, %1 : i32
    %9 = arith.select %7, %8, %2 : i32
    %c2_i32_3 = arith.constant 2 : i32
    %10 = arith.muli %c2_i32_3, %arg1 : i32
    %c0_i32_4 = arith.constant 0 : i32
    %11 = arith.subi %c0_i32_4, %10 : i32
    %12 = arith.muli %9, %11 : i32
    %13 = arith.addi %arg1, %12 : i32
    %c0_i32_5 = arith.constant 0 : i32
    %c0_i32_6 = arith.constant 0 : i32
    return %c0_i32_5, %13 : i32, i32
  }
  func.func @transform_2(%arg0: i32, %arg1: i32) -> (i32, i32) {
    %c2_i32 = arith.constant 2 : i32
    %c0_i32 = arith.constant 0 : i32
    %0 = arith.cmpi eq, %c2_i32, %c0_i32 : i32
    %c1_i32 = arith.constant 1 : i32
    %1 = arith.select %0, %c1_i32, %c2_i32 : i32
    %2 = arith.remsi %arg0, %1 : i32
    %c0_i32_0 = arith.constant 0 : i32
    %3 = arith.cmpi ne, %2, %c0_i32_0 : i32
    %c0_i32_1 = arith.constant 0 : i32
    %4 = arith.cmpi slt, %2, %c0_i32_1 : i32
    %c0_i32_2 = arith.constant 0 : i32
    %5 = arith.cmpi slt, %1, %c0_i32_2 : i32
    %6 = arith.xori %4, %5 : i1
    %7 = arith.andi %6, %3 : i1
    %8 = arith.addi %2, %1 : i32
    %9 = arith.select %7, %8, %2 : i32
    %c2_i32_3 = arith.constant 2 : i32
    %10 = arith.muli %c2_i32_3, %arg1 : i32
    %c0_i32_4 = arith.constant 0 : i32
    %11 = arith.subi %c0_i32_4, %10 : i32
    %12 = arith.muli %9, %11 : i32
    %13 = arith.addi %arg1, %12 : i32
    %c0_i32_5 = arith.constant 0 : i32
    %c0_i32_6 = arith.constant 0 : i32
    return %c0_i32_5, %13 : i32, i32
  }
  func.func @transform_3(%arg0: i32, %arg1: i32) -> (i32, i32) {
    %c2_i32 = arith.constant 2 : i32
    %c0_i32 = arith.constant 0 : i32
    %0 = arith.cmpi eq, %c2_i32, %c0_i32 : i32
    %c1_i32 = arith.constant 1 : i32
    %1 = arith.select %0, %c1_i32, %c2_i32 : i32
    %2 = arith.remsi %arg0, %1 : i32
    %c0_i32_0 = arith.constant 0 : i32
    %3 = arith.cmpi ne, %2, %c0_i32_0 : i32
    %c0_i32_1 = arith.constant 0 : i32
    %4 = arith.cmpi slt, %2, %c0_i32_1 : i32
    %c0_i32_2 = arith.constant 0 : i32
    %5 = arith.cmpi slt, %1, %c0_i32_2 : i32
    %6 = arith.xori %4, %5 : i1
    %7 = arith.andi %6, %3 : i1
    %8 = arith.addi %2, %1 : i32
    %9 = arith.select %7, %8, %2 : i32
    %c2_i32_3 = arith.constant 2 : i32
    %10 = arith.muli %c2_i32_3, %arg1 : i32
    %c0_i32_4 = arith.constant 0 : i32
    %11 = arith.subi %c0_i32_4, %10 : i32
    %12 = arith.muli %9, %11 : i32
    %13 = arith.addi %arg1, %12 : i32
    %c0_i32_5 = arith.constant 0 : i32
    %c0_i32_6 = arith.constant 0 : i32
    return %13, %c0_i32_5 : i32, i32
  }
  func.func @transform_4(%arg0: i32, %arg1: i32) -> (i32, i32) {
    %c0_i32 = arith.constant 0 : i32
    %c0_i32_0 = arith.constant 0 : i32
    %c0_i32_1 = arith.constant 0 : i32
    return %c0_i32, %c0_i32_0 : i32, i32
  }
  func.func @transform_5(%arg0: i32, %arg1: i32) -> (i32, i32) {
    %c0_i32 = arith.constant 0 : i32
    %c0_i32_0 = arith.constant 0 : i32
    return %arg0, %c0_i32 : i32, i32
  }
}

</mosaic_0001>

<bundles_post_ra>
// kernel: tpu_custom_call.1
= control target key start
LH: loop header
LB: loop body
LE: loop exit
PB: predicated region body
PF: predicated region fallthrough
CT: control target
= control target key end

     0   :  { %10 = vsyncpa [#allocation3], 0  ;;  %s534_s0 = inlined_call_operand.hbm [shape: f32[16,128], index: 0, kind: input, shape index: {}]   ;;  %s535_s1 = inlined_call_operand.hbm [shape: f32[128,128], index: 1, kind: input, shape index: {}]   ;;  %s536_s2 = inlined_call_operand.vmem [shape: f32[1,128], index: 2, kind: input, shape index: {}]   ;;  %s537_s3 = inlined_call_operand.hbm [shape: f32[128,128], index: 3, kind: input, shape index: {}]   ;;  %s538_s4 = inlined_call_operand.vmem [shape: f32[1,128], index: 4, kind: input, shape index: {}]   ;;  %s539_s5 = inlined_call_operand.hbm [shape: f32[16,128], index: 5, kind: output, shape index: {}]  }
   0x1   :  { %11 = vsyncpa [#allocation6], 0 }
   0x2   :  { %12 = vsyncpa [#allocation4], 0  ;;  %s44_s20 = sshll.u32 %s535_s1, 4  ;;  %s468_s21 = smov [#allocation5]   ;;  %s45_s20 = int_to_ptr.hbm [resolvable:$true] %s44_s20 }
   0x3   :  { %s46_s22 = sshll.u32 %s468_s21, 4  ;;  %s17_s25 = sshll.u32 %s534_s0, 4  ;;  %s47_s22 = int_to_ptr.vmem [resolvable:$true] %s46_s22  ;;  %s18_s25 = int_to_ptr.hbm [resolvable:$true] %s17_s25 }
   0x4   :  { %s469_s26 = smov 128   ;;  %s470_s27 = smov 8  }
   0x5   :  { %52 = dma.hbm_to_vmem [thread:$0]  %s45_s20, 2048, %s47_s22, [#allocation6], %s469_s26, %s469_s26, %s470_s27  }
   0x6   :  { %s471_s28 = smov [#allocation2]   ;;  %s101_s1 = sshll.u32 %s537_s3, 4  ;;  %s102_s1 = int_to_ptr.hbm [resolvable:$true] %s101_s1 }
   0x7   :  { %s19_s29 = sshll.u32 %s471_s28, 4  ;;  %s472_s0 = smov [#allocation7]   ;;  %s20_s29 = int_to_ptr.vmem [resolvable:$true] %s19_s29 }
   0x8   :  { %25 = dma.hbm_to_vmem [thread:$0]  %s18_s25, 256, %s20_s29, [#allocation3], %s469_s26, %s469_s26, %s470_s27  }
   0x9   :  { %s103_s7 = sshll.u32 %s472_s0, 4  ;;  %s104_s7 = int_to_ptr.vmem [resolvable:$true] %s103_s7 }
   0xa   :  { %109 = dma.hbm_to_vmem [thread:$0]  %s102_s1, 2048, %s104_s7, [#allocation6], %s469_s26, %s469_s26, %s470_s27  }
   0xb   :  { %462 = dma.done.wait [#allocation3], 256  }
   0xc   :  { %463 = vsyncadd [#allocation3], 4294967040 }
   0xd   :  { %464 = dma.done.wait [#allocation6], 4096  }
   0xe   :  { %465 = vsyncadd [#allocation6], 4294963200  ;;  %v208_v0 = vld [vmem:[#allocation5 + $0x78] sm:$0xff]  ;;  %v207_v1 = vld [vmem:[#allocation5 + $0x70] sm:$0xff]  ;;  %s473_s11 = smov [#allocation8]  }
   0xf   :  { %326 = vmatpush.msra.mxu2 %v208_v0  ;;  %213 = vmatpush.msra.mxu0 %v208_v0  ;;  %v206_v2 = vld [vmem:[#allocation5 + $0x68] sm:$0xff]  ;;  %v205_v3 = vld [vmem:[#allocation5 + $0x60] sm:$0xff]  ;;  %v204_v4 = vld [vmem:[#allocation5 + $0x58] sm:$0xff]  ;;  %s303_s12 = sshll.u32 %s473_s11, 4  ;;  %s304_s12 = int_to_ptr.vmem [resolvable:$true] %s303_s12 }
  0x10   :  { %v253_v5 = vld [vmem:[#allocation7 + $0x78] sm:$0xff]  ;;  %v252_v6 = vld [vmem:[#allocation7 + $0x70] sm:$0xff]  ;;  %v251_v8 = vld [vmem:[#allocation7 + $0x68] sm:$0xff] }
  0x11   :  { %327 = vmatpush.msra.mxu2 %v207_v1  ;;  %214 = vmatpush.msra.mxu0 %v207_v1  ;;  %v203_v7 = vld [vmem:[#allocation5 + $0x50] sm:$0xff]  ;;  %v202_v9 = vld [vmem:[#allocation5 + $0x48] sm:$0xff]  ;;  %v250_v10 = vld [vmem:[#allocation7 + $0x60] sm:$0xff] }
  0x12   :  { %342 = vmatpush.msra.mxu3 %v253_v5  ;;  %254 = vmatpush.msra.mxu1 %v253_v5  ;;  %v201_v11 = vld [vmem:[#allocation5 + $0x40] sm:$0xff]  ;;  %v249_v12 = vld [vmem:[#allocation7 + $0x58] sm:$0xff]  ;;  %v248_v14 = vld [vmem:[#allocation7 + $0x50] sm:$0xff] }
  0x13   :  { %328 = vmatpush.msra.mxu2 %v206_v2  ;;  %215 = vmatpush.msra.mxu0 %v206_v2  ;;  %v200_v13 = vld [vmem:[#allocation5 + $0x38] sm:$0xff]  ;;  %v199_v15 = vld [vmem:[#allocation5 + $0x30] sm:$0xff]  ;;  %v247_v16 = vld [vmem:[#allocation7 + $0x48] sm:$0xff] }
  0x14   :  { %343 = vmatpush.msra.mxu3 %v252_v6  ;;  %255 = vmatpush.msra.mxu1 %v252_v6  ;;  %v198_v17 = vld [vmem:[#allocation5 + $0x28] sm:$0xff]  ;;  %v246_v18 = vld [vmem:[#allocation7 + $0x40] sm:$0xff]  ;;  %v245_v20 = vld [vmem:[#allocation7 + $0x38] sm:$0xff] }
  0x15   :  { %329 = vmatpush.msra.mxu2 %v205_v3  ;;  %216 = vmatpush.msra.mxu0 %v205_v3  ;;  %v197_v19 = vld [vmem:[#allocation5 + $0x20] sm:$0xff]  ;;  %v196_v21 = vld [vmem:[#allocation5 + $0x18] sm:$0xff]  ;;  %v244_v22 = vld [vmem:[#allocation7 + $0x30] sm:$0xff] }
  0x16   :  { %344 = vmatpush.msra.mxu3 %v251_v8  ;;  %256 = vmatpush.msra.mxu1 %v251_v8  ;;  %v195_v23 = vld [vmem:[#allocation5 + $0x10] sm:$0xff]  ;;  %v243_v24 = vld [vmem:[#allocation7 + $0x28] sm:$0xff]  ;;  %v242_v26 = vld [vmem:[#allocation7 + $0x20] sm:$0xff] }
  0x17   :  { %330 = vmatpush.msra.mxu2 %v204_v4  ;;  %217 = vmatpush.msra.mxu0 %v204_v4  ;;  %v194_v25 = vld [vmem:[#allocation5 + $0x8] sm:$0xff]  ;;  %v193_v27 = vld [vmem:[#allocation5] sm:$0xff]  ;;  %v192_v28 = vld [vmem:[#allocation2 + $0x8] sm:$0xff] }
  0x18   :  { %345 = vmatpush.msra.mxu3 %v250_v10  ;;  %257 = vmatpush.msra.mxu1 %v250_v10  ;;  %v191_v29 = vld [vmem:[#allocation2] sm:$0xff]  ;;  %v241_v30 = vld [vmem:[#allocation7 + $0x18] sm:$0xff]  ;;  %v239_v32 = vld [vmem:[#allocation7 + $0x8] sm:$0xff] }
  0x19   :  { %331 = vmatpush.msra.mxu2 %v203_v7  ;;  %218 = vmatpush.msra.mxu0 %v203_v7  ;;  %v240_v31 = vld [vmem:[#allocation7 + $0x10] sm:$0xff]  ;;  %v238_v33 = vld [vmem:[#allocation7] sm:$0xff] }
  0x1a   :  { %346 = vmatpush.msra.mxu3 %v249_v12  ;;  %258 = vmatpush.msra.mxu1 %v249_v12  ;;  %v364_v34 = vld [vmem:[%s536_s2] ss:$0 sm:$0xff]  ;;  %s305_s2 = sshll.u32 %s539_s5, 4  ;;  %s306_s2 = int_to_ptr.hbm [resolvable:$true] %s305_s2 }
  0x1b   :  { %332 = vmatpush.msra.mxu2 %v202_v9  ;;  %219 = vmatpush.msra.mxu0 %v202_v9  ;;  %v365_v41 = vld [vmem:[%s538_s4] ss:$0 sm:$0xff] }
  0x1c   :  { %347 = vmatpush.msra.mxu3 %v248_v14  ;;  %259 = vmatpush.msra.mxu1 %v248_v14 }
  0x1d   :  { %333 = vmatpush.msra.mxu2 %v201_v11  ;;  %220 = vmatpush.msra.mxu0 %v201_v11 }
  0x1e   :  { %348 = vmatpush.msra.mxu3 %v247_v16  ;;  %260 = vmatpush.msra.mxu1 %v247_v16 }
  0x1f   :  { %334 = vmatpush.msra.mxu2 %v200_v13  ;;  %221 = vmatpush.msra.mxu0 %v200_v13 }
  0x20   :  { %349 = vmatpush.msra.mxu3 %v246_v18  ;;  %261 = vmatpush.msra.mxu1 %v246_v18 }
  0x21   :  { %335 = vmatpush.msra.mxu2 %v199_v15  ;;  %222 = vmatpush.msra.mxu0 %v199_v15 }
  0x22   :  { %350 = vmatpush.msra.mxu3 %v245_v20  ;;  %262 = vmatpush.msra.mxu1 %v245_v20 }
  0x23   :  { %336 = vmatpush.msra.mxu2 %v198_v17  ;;  %223 = vmatpush.msra.mxu0 %v198_v17 }
  0x24   :  { %351 = vmatpush.msra.mxu3 %v244_v22  ;;  %263 = vmatpush.msra.mxu1 %v244_v22 }
  0x25   :  { %337 = vmatpush.msra.mxu2 %v197_v19  ;;  %224 = vmatpush.msra.mxu0 %v197_v19 }
  0x26   :  { %352 = vmatpush.msra.mxu3 %v243_v24  ;;  %264 = vmatpush.msra.mxu1 %v243_v24 }
  0x27   :  { %338 = vmatpush.msra.mxu2 %v196_v21  ;;  %225 = vmatpush.msra.mxu0 %v196_v21 }
  0x28   :  { %353 = vmatpush.msra.mxu3 %v242_v26  ;;  %265 = vmatpush.msra.mxu1 %v242_v26 }
  0x29   :  { %339 = vmatpush.msra.mxu2 %v195_v23  ;;  %226 = vmatpush.msra.mxu0 %v195_v23 }
  0x2a   :  { %354 = vmatpush.msra.mxu3 %v241_v30  ;;  %266 = vmatpush.msra.mxu1 %v241_v30 }
  0x2b   :  { %340 = vmatpush.msra.mxu2 %v194_v25  ;;  %227 = vmatpush.msra.mxu0 %v194_v25 }
  0x2c   :  { %355 = vmatpush.msra.mxu3 %v240_v31  ;;  %267 = vmatpush.msra.mxu1 %v240_v31 }
  0x2d   :  { %341 = vmatpush.msra.mxu2 %v193_v27  ;;  %228 = vmatpush.msra.mxu0 %v193_v27 }
  0x2e   :  { %232 = vmatmul.f32.vlgmr.msra.gmra.mxu2 %v192_v28  ;;  %229 = vmatmul.f32.vlgmr.msra.gmra.mxu0 %v191_v29 }
  0x2f   :  { %356 = vmatpush.msra.mxu3 %v239_v32  ;;  %268 = vmatpush.msra.mxu1 %v239_v32 }
  0x31   :  { %357 = vmatpush.msra.mxu3 %v238_v33  ;;  %269 = vmatpush.msra.mxu1 %v238_v33 }
  0xab   :  { %v230_v35 = vpop.f32.mrf.mxu0 }
  0xac   :  { %v231_v36 = vadd.f32 %v364_v34, %v230_v35 }
  0xae   :  { %v236_v37 = vmax.f32 %v231_v36, 0.0 }
  0xb0   :  { %270 = vmatmul.f32.vlgmr.msra.gmra.mxu1 %v236_v37 }
  0xb1   :  { %v233_v38 = vpop.f32.mrf.mxu2 }
  0xb2   :  { %v234_v39 = vadd.f32 %v364_v34, %v233_v38 }
  0xb4   :  { %v237_v40 = vmax.f32 %v234_v39, 0.0 }
  0xb6   :  { %273 = vmatmul.f32.vlgmr.msra.gmra.mxu3 %v237_v40 }
 0x12d   :  { %v271_v42 = vpop.f32.mrf.mxu1 }
 0x12e   :  { %v285_v43 = vadd.f32 %v365_v41, %v271_v42 }
 0x130   :  { %287 = vst [vmem:[#allocation8] sm:$0xff] %v285_v43 }
 0x139   :  { %v274_v44 = vpop.f32.mrf.mxu3 }
 0x13a   :  { %v286_v45 = vadd.f32 %v365_v41, %v274_v44 }
 0x13c   :  { %288 = vst [vmem:[#allocation8 + $0x8] sm:$0xff] %v286_v45 }
 0x13d   :  { %311 = dma.vmem_to_hbm [thread:$0]  %s304_s12, 256, %s306_s2, [#allocation4], %s469_s26, %s469_s26, %s470_s27  }
 0x13e   :  { %466 = dma.done.wait [#allocation4], 256  }
 0x13f   :  { %467 = vsyncadd [#allocation4], 4294967040 }
 0x140   :  { %316 = vsyncpa [#allocation3], 1 }
 0x141   :  { %317 = vsyncpa [#allocation6], 1 }
 0x142   :  { %318 = vsyncpa [#allocation4], 1 }

</bundles_post_ra>
